<compile_context>
chip_gen: v7x
topology: tpu7x:2x2x1
jax: 0.10.0
libtpu: 0.0.40
codegen_flags: <defaults>
</compile_context>

<pallas_src>
import numpy as np
import jax
import jax.numpy as jnp
from jax import lax
from jax.experimental import pallas as pl
from jax.experimental.pallas import tpu as pltpu

NJOINT = 26          # SKEL25DEF.joint_size + 1
NPAF = 52            # SKEL25DEF.paf_size * 2
NLIMB = 26           # len(mapIdx); mapIdx[k] == [2k, 2k+1]
MAXP = 8             # max peaks kept per joint (fixed-size padding of dynamic lists)
MID_NUM = 10         # samples along each candidate limb
NPAIR = MAXP * MAXP                  # 64 candidate (A, B) pairs per limb
QTOT = NPAIR * MID_NUM               # 640 flat samples per limb

_LANE_TILE = 512     # backbone lane tile (multiple of 128); ~0.4 MiB double-buffered
_PAF_CB = 2          # PAF-average channel block (matches mapIdx pairing)

# BODY_25-style limb sequence (joint index pairs), 26 limbs.
# TODO(synk): SKEL25DEF.paf_dict is defined outside the given module; this is the
# standard BODY_25 pairing used deterministically here.
LIMB_SEQ = [[1, 8], [1, 2], [1, 5], [2, 3], [3, 4], [5, 6], [6, 7], [8, 9],
            [9, 10], [10, 11], [8, 12], [12, 13], [13, 14], [1, 0], [0, 15],
            [15, 17], [0, 16], [16, 18], [14, 19], [19, 20], [14, 21],
            [11, 22], [22, 23], [11, 24], [2, 17], [5, 18]]


# ----------------------------------------------------------------------------
# Pallas kernels
# ----------------------------------------------------------------------------
def _backbone_kernel(x_ref, w_ref, b_ref, o_ref):
    # `data = padded_image / 256 - 0.5` is folded into w/b on the host; the kernel
    # is a pure (memory-bound, K=8) matmul + bias over one lane tile.
    o_ref[...] = jnp.dot(w_ref[...], x_ref[...],
                         preferred_element_type=jnp.float32) + b_ref[...]


def _mean_scales_kernel(x_ref, o_ref):
    # heatmap_avg += map / n_scales, summed over scales (one channel block per step)
    s = x_ref.shape[0]
    o_ref[...] = jnp.sum(x_ref[...] * (1.0 / s), axis=0)


def _make_mean_blur_kernel(S, H, W, w1d):
    # Fused: average over scales + separable 11-tap Gaussian blur, per channel.
    K = len(w1d)
    inv_s = 1.0 / S

    def kernel(xp_ref, o_ref):
        # xp_ref: (S, 1, H+K-1, W+K-1) reflect-padded per-scale heatmaps, one channel
        avg = jnp.sum(xp_ref[...] * inv_s, axis=0)         # (1, H+K-1, W+K-1)
        tmp = jnp.zeros((1, H + K - 1, W), jnp.float32)
        for k in range(K):                                 # blur along W
            tmp = tmp + float(w1d[k]) * avg[:, :, k:k + W]
        out = jnp.zeros((1, H, W), jnp.float32)
        for k in range(K):                                 # then along H
            out = out + float(w1d[k]) * tmp[:, k:k + H, :]
        o_ref[...] = out

    return kernel


def _make_peak_kernel(H, W, thre1):
    # Single input: the -inf padded blurred heatmap; center sliced in-kernel.
    def kernel(xp_ref, o_ref):
        xp = xp_ref[0]                                     # (H+2, W+2), -inf padded
        x = xp[1:H + 1, 1:W + 1]                           # center == blurred heatmap
        m = jnp.full((H, W), -jnp.inf, jnp.float32)
        for dy in range(3):                                # 3x3 max-pool, stride 1, pad 1
            for dx in range(3):
                m = jnp.maximum(m, xp[dy:dy + H, dx:dx + W])
        mask = jnp.logical_and(x == m, x > thre1)
        o_ref[0] = mask.astype(jnp.float32)

    return kernel


def _make_paf_kernel(H, W, paf_thres):
    P = MAXP
    PM = P * MID_NUM

    def kernel(paf_ref, pa_ref, pb_ref, o_ref):
        # paf_ref: (2, H, W) VMEM -> paf channels [2k, 2k+1] for this limb
        # pa_ref/pb_ref: (NLIMB, 2*MAXP) SMEM: cols [0:P] = x coords, [P:2P] = y coords
        k = pl.program_id(0)

        # flat sample index q = (i*P + j)*MID_NUM + s, decomposed in f32 (exact)
        qf = lax.broadcasted_iota(jnp.int32, (QTOT, 1), 0).astype(jnp.float32)
        i_f = jnp.floor((qf + 0.5) * (1.0 / PM))           # A-peak index
        rf = qf - i_f * float(PM)
        j_f = jnp.floor((rf + 0.5) * (1.0 / MID_NUM))      # B-peak index
        s_f = rf - j_f * float(MID_NUM)                    # sample index along the limb
        t = s_f * (1.0 / float(MID_NUM - 1))               # linspace(0, 1, MID_NUM)

        # gather-free coordinate broadcast from the SMEM scalar tables
        ax = jnp.zeros((QTOT, 1), jnp.float32)
        ay = jnp.zeros((QTOT, 1), jnp.float32)
        bx = jnp.zeros((QTOT, 1), jnp.float32)
        by = jnp.zeros((QTOT, 1), jnp.float32)
        for p in range(P):
            pf = float(p)
            ax = jnp.where(i_f == pf, pa_ref[k, p], ax)
            ay = jnp.where(i_f == pf, pa_ref[k, P + p], ay)
            bx = jnp.where(j_f == pf, pb_ref[k, p], bx)
            by = jnp.where(j_f == pf, pb_ref[k, P + p], by)

        vx = bx - ax
        vy = by - ay
        norm = jnp.sqrt(vx * vx + vy * vy) + 1e-10
        ux = vx / norm
        uy = vy / norm

        sx = ax + t * vx                                   # sample points A + t*(B-A)
        sy = ay + t * vy
        ixf = jnp.clip(jnp.floor(sx), 0.0, float(W - 1))   # .long() == floor (coords >= 0)
        iyf = jnp.clip(jnp.floor(sy), 0.0, float(H - 1))

        col_w = lax.broadcasted_iota(jnp.int32, (QTOT, W), 1).astype(jnp.float32)
        col_h = lax.broadcasted_iota(jnp.int32, (QTOT, H), 1).astype(jnp.float32)
        indx = (ixf == col_w).astype(jnp.float32)          # (QTOT, W) one-hot
        indy = (iyf == col_h).astype(jnp.float32)          # (QTOT, H) one-hot

        # MXU gather: rows[q, :] = paf[iy[q], :]; then pick column ix[q] on the VPU.
        rows_x = jnp.dot(indy, paf_ref[0], preferred_element_type=jnp.float32)
        rows_y = jnp.dot(indy, paf_ref[1], preferred_element_type=jnp.float32)
        samp_x = jnp.sum(rows_x * indx, axis=1, keepdims=True)   # (QTOT, 1)
        samp_y = jnp.sum(rows_y * indx, axis=1, keepdims=True)

        score_mid = samp_x * ux + samp_y * uy                    # (QTOT, 1)

        # mean over the MID_NUM samples of each (i, j) pair via a pooling matmul
        qq = lax.broadcasted_iota(jnp.int32, (NPAIR, QTOT), 1)
        cc = lax.broadcasted_iota(jnp.int32, (NPAIR, QTOT), 0)
        pool = jnp.logical_and(qq >= cc * MID_NUM,
                               qq < (cc + 1) * MID_NUM).astype(jnp.float32)
        pool = pool * (1.0 / MID_NUM)
        score = jnp.dot(pool, score_mid, preferred_element_type=jnp.float32)  # (NPAIR, 1)

        score = jnp.clip(score, 0.0, 1.0)
        score = jnp.where(score > paf_thres, score, jnp.zeros_like(score))
        o_ref[0] = score

    return kernel


# ----------------------------------------------------------------------------
# Glue wrappers
# ----------------------------------------------------------------------------
def run_backbone(img_padded, Wmat, bvec):
    # img_padded: (3, Hp, Wp) float32 (unnormalized, pad value 128)
    _, Hp, Wp = img_padded.shape
    HW = Hp * Wp
    HWp = ((HW + _LANE_TILE - 1) // _LANE_TILE) * _LANE_TILE
    nch = NJOINT + NPAF                     # 78 real output channels
    ncp = 80                                # padded to a sublane multiple of 8

    # pad input channels 3 -> 8 with the pad value (128 normalizes to exactly 0,
    # so extra channels contribute nothing even after the weight fold below)
    x = jnp.concatenate(
        [img_padded, jnp.full((8 - img_padded.shape[0], Hp, Wp), 128.0, jnp.float32)],
        axis=0).reshape(8, HW)
    x = jnp.pad(x, ((0, 0), (0, HWp - HW)), constant_values=128.0)

    # fold `data = x/256 - 0.5` into the weights:  W' = W/256,  b' = b - 0.5*W.sum(1)
    w_full = jnp.pad(Wmat, ((0, ncp - nch), (0, 0)))
    b_full = jnp.pad(bvec, ((0, ncp - nch), (0, 0)))
    w_fold = w_full / 256.0
    b_fold = b_full - 0.5 * jnp.sum(w_full, axis=1, keepdims=True)

    out = pl.pallas_call(
        _backbone_kernel,
        grid=(HWp // _LANE_TILE,),
        in_specs=[pl.BlockSpec((8, _LANE_TILE), lambda i: (0, i)),
                  pl.BlockSpec((ncp, 8), lambda i: (0, 0)),
                  pl.BlockSpec((ncp, 1), lambda i: (0, 0))],
        out_specs=pl.BlockSpec((ncp, _LANE_TILE), lambda i: (0, i)),
        out_shape=jax.ShapeDtypeStruct((ncp, HWp), jnp.float32),
        compiler_params=pltpu.CompilerParams(dimension_semantics=("parallel",)),
    )(x, w_fold, b_fold)
    return out[:nch, :HW].reshape(nch, Hp, Wp)


def get_heatmap_and_paf(m, multiplier, image, Wmat, bvec, stride=8, padValue=128):
    # TODO(synk): bodypose_25_model (VGG19 + refinement stages) and its .pth weights
    # are external; replaced by a deterministic 1x1-conv stand-in Pallas kernel.
    c0, h0, w0 = image.shape
    ht, wt = int(h0 * multiplier[m]), int(w0 * multiplier[m])
    # TODO(synk): torchvision (bi)cubic/bilinear Resize approximated with jax.image.resize.
    img_t = jax.image.resize(image, (c0, ht, wt), method="bilinear")
    pad_w = 0 if wt % stride == 0 else stride - wt % stride
    pad_h = 0 if ht % stride == 0 else stride - ht % stride
    img_p = jnp.pad(img_t, ((0, 0), (0, pad_h), (0, pad_w)),
                    constant_values=float(padValue))
    out = run_backbone(img_p, Wmat, bvec)
    # the real body_25 net emits maps at 1/stride resolution; mimic that here.
    small = out[:, ::stride, ::stride]
    ch, hs, ws = small.shape
    up = jax.image.resize(small, (ch, hs * stride, ws * stride), method="cubic")
    up = up[:, :ht, :wt]
    up = jax.image.resize(up, (ch, h0, w0), method="cubic")
    return up[:NJOINT], up[NJOINT:]


def openpose_forward(image_hwc, Wmat, bvec, scale_search=(0.7, 1.0, 1.3),
                     boxsize=368, stride=8, padValue=128, thre1=0.1,
                     paf_thres=0.4):
    img = jnp.asarray(image_hwc).astype(jnp.float32)
    img = jnp.transpose(img, (2, 0, 1))[::-1]              # HWC -> CHW, flip channel axis
    _, h, w = img.shape
    multiplier = [s * boxsize / h for s in scale_search]
    S = len(multiplier)

    hm_list, paf_list = [], []
    for m in range(S):
        hm, pf = get_heatmap_and_paf(m, multiplier, img, Wmat, bvec, stride, padValue)
        hm_list.append(hm)
        paf_list.append(pf)
    hm_stack = jnp.stack(hm_list, axis=0)                  # (S, 26, h, w)
    paf_stack = jnp.stack(paf_list, axis=0)                # (S, 52, h, w)

    # PAF channels: average over scales (channel-tiled, pipelined)
    paf_avg = pl.pallas_call(
        _mean_scales_kernel,
        grid=(NPAF // _PAF_CB,),
        in_specs=[pl.BlockSpec((S, _PAF_CB, h, w), lambda c: (0, c, 0, 0))],
        out_specs=pl.BlockSpec((_PAF_CB, h, w), lambda c: (c, 0, 0)),
        out_shape=jax.ShapeDtypeStruct((NPAF, h, w), jnp.float32),
        compiler_params=pltpu.CompilerParams(dimension_semantics=("parallel",)),
    )(paf_stack)

    # Heatmap channels: fused scale-average + GaussianBlur(kernel_size=11, sigma=3)
    # (torchvision semantics: reflect padding, separable Gaussian)
    ks, sigma = 11, 3.0
    xs = np.linspace(-(ks - 1) * 0.5, (ks - 1) * 0.5, ks)
    pdf = np.exp(-0.5 * (xs / sigma) ** 2)
    w1d = (pdf / pdf.sum()).astype(np.float32)
    pad = ks // 2
    hm_pad = jnp.pad(hm_stack, ((0, 0), (0, 0), (pad, pad), (pad, pad)), mode="reflect")
    heatmap_blur = pl.pallas_call(
        _make_mean_blur_kernel(S, h, w, w1d),
        grid=(NJOINT,),
        in_specs=[pl.BlockSpec((S, 1, h + ks - 1, w + ks - 1), lambda c: (0, c, 0, 0))],
        out_specs=pl.BlockSpec((1, h, w), lambda c: (c, 0, 0)),
        out_shape=jax.ShapeDtypeStruct((NJOINT, h, w), jnp.float32),
        compiler_params=pltpu.CompilerParams(dimension_semantics=("parallel",)),
    )(hm_pad)

    # peak mask: (x == maxpool3x3(x)) & (x > thre1); single -inf padded input
    hm_inf = jnp.pad(heatmap_blur, ((0, 0), (1, 1), (1, 1)),
                     constant_values=-jnp.inf)
    peak_mask = pl.pallas_call(
        _make_peak_kernel(h, w, thre1),
        grid=(NJOINT,),
        in_specs=[pl.BlockSpec((1, h + 2, w + 2), lambda c: (c, 0, 0))],
        out_specs=pl.BlockSpec((1, h, w), lambda c: (c, 0, 0)),
        out_shape=jax.ShapeDtypeStruct((NJOINT, h, w), jnp.float32),
        compiler_params=pltpu.CompilerParams(dimension_semantics=("parallel",)),
    )(hm_inf)

    # TODO(synk): torch.nonzero produces dynamic-length lists; extracted host-side.
    mask_np = np.asarray(jax.block_until_ready(peak_mask))
    hm_np = np.asarray(heatmap_blur)
    all_peaks = []
    for part in range(NJOINT - 1):
        ys, xs_ = np.nonzero(mask_np[part] > 0.5)
        pk = [np.array([float(x), float(y), hm_np[part, y, x]], dtype=np.float32)
              for y, x in zip(ys, xs_)]
        all_peaks.append(pk)

    # fixed-size padded peak tables for the PAF line-integral kernel (SMEM tables)
    # layout: (NLIMB, 2*MAXP): cols [0:MAXP] = x coords, [MAXP:2*MAXP] = y coords
    peaksA = np.zeros((NLIMB, 2 * MAXP), np.float32)
    peaksB = np.zeros((NLIMB, 2 * MAXP), np.float32)
    nA, nB = [], []
    for k in range(NLIMB):
        cA = all_peaks[LIMB_SEQ[k][0]][:MAXP]
        cB = all_peaks[LIMB_SEQ[k][1]][:MAXP]
        nA.append(len(cA))
        nB.append(len(cB))
        for i, p in enumerate(cA):
            peaksA[k, i], peaksA[k, MAXP + i] = p[0], p[1]
        for j, p in enumerate(cB):
            peaksB[k, j], peaksB[k, MAXP + j] = p[0], p[1]

    scores = pl.pallas_call(
        _make_paf_kernel(h, w, paf_thres),
        grid=(NLIMB,),
        in_specs=[
            pl.BlockSpec((2, h, w), lambda k: (k, 0, 0)),            # paf chans [2k, 2k+1]
            pl.BlockSpec(memory_space=pltpu.MemorySpace.SMEM),       # A-peak table
            pl.BlockSpec(memory_space=pltpu.MemorySpace.SMEM),       # B-peak table
        ],
        out_specs=pl.BlockSpec((1, NPAIR, 1), lambda k: (k, 0, 0)),
        out_shape=jax.ShapeDtypeStruct((NLIMB, NPAIR, 1), jnp.float32),
        compiler_params=pltpu.CompilerParams(dimension_semantics=("parallel",)),
    )(paf_avg, jnp.asarray(peaksA), jnp.asarray(peaksB))
    scores = jax.block_until_ready(scores).reshape(NLIMB, MAXP, MAXP)
    scores_np = np.asarray(scores)

    # filter padded peak slots host-side via the true counts nA/nB
    all_connections = []
    for k in range(NLIMB):
        all_connections.append(
            [[float(scores_np[k, i, j]) for j in range(nB[k])] for i in range(nA[k])]
        )

    return {
        "joints": all_peaks,          # list (25) of lists of [x, y, score]
        "pafs": all_connections,      # list (26) of nA x nB score lists
        "heatmap_avg": heatmap_blur,  # NOTE: blurred average (what the reference uses downstream)
        "paf_avg": paf_avg,
        "paf_scores": scores,
    }


# ----------------------------------------------------------------------------
if __name__ == "__main__":
    key = jax.random.PRNGKey(0)
    k_img, k_w, k_b = jax.random.split(key, 3)

    # small deterministic input image (H, W, C) uint8
    image = np.asarray(
        jax.random.randint(k_img, (16, 16, 3), 0, 256, dtype=jnp.int32)
    ).astype(np.uint8)

    # deterministic stand-in weights for the (absent) body_25 checkpoint
    Wmat = jax.random.normal(k_w, (NJOINT + NPAF, 8), jnp.float32) * 0.8
    Wmat = Wmat.at[:, 3:].set(0.0)          # only the 3 real image channels contribute
    bvec = jax.random.normal(k_b, (NJOINT + NPAF, 1), jnp.float32) * 0.1

    # boxsize=16 keeps the multi-scale pyramid small (module default is 368)
    det = openpose_forward(image, Wmat, bvec, boxsize=16)
    jax.block_until_ready(det["paf_avg"])
    jax.block_until_ready(det["paf_scores"])
    print("KERNEL_OK")
</pallas_src>

<mosaic_0001>
module attributes {stable_mosaic.version = 11 : i64} {
  func.func @_backbone_kernel(%arg0: i32, %arg1: memref<8x512xf32, #tpu.memory_space<vmem>>, %arg2: memref<80x8xf32, #tpu.memory_space<vmem>>, %arg3: memref<80x1xf32, #tpu.memory_space<vmem>>, %arg4: memref<80x512xf32, #tpu.memory_space<vmem>>) attributes {dimension_semantics = [#tpu.dimension_semantics<parallel>], iteration_bounds = array<i64: 1>, scalar_prefetch = 0 : i64, scratch_operands = 0 : i64, tpu.core_type = #tpu.core_type<tc>, window_params = [{transform_indices = @transform_0, window_bounds = array<i64: 8, 512>}, {pipeline_mode = #tpu.pipeline_mode<synchronous>, transform_indices = @transform_1, window_bounds = array<i64: 80, 8>}, {pipeline_mode = #tpu.pipeline_mode<synchronous>, transform_indices = @transform_2, window_bounds = array<i64: 80, 1>}, {transform_indices = @transform_3, window_bounds = array<i64: 80, 512>}]} {
    %c0 = arith.constant 0 : index
    %c0_0 = arith.constant 0 : index
    %0 = vector.load %arg2[%c0, %c0_0] : memref<80x8xf32, #tpu.memory_space<vmem>>, vector<80x8xf32>
    %c0_1 = arith.constant 0 : index
    %c0_2 = arith.constant 0 : index
    %1 = vector.load %arg1[%c0_1, %c0_2] : memref<8x512xf32, #tpu.memory_space<vmem>>, vector<8x512xf32>
    %cst = arith.constant dense<0.000000e+00> : vector<80x512xf32>
    %2 = tpu.matmul %0, %1, %cst {dimension_numbers = #tpu.dot_dimension_numbers<[1], [0], [0], [1], [0, 0, 1, 1], [], []>} : vector<80x8xf32>, vector<8x512xf32>, vector<80x512xf32> -> vector<80x512xf32>
    %c0_3 = arith.constant 0 : index
    %c0_4 = arith.constant 0 : index
    %3 = vector.load %arg3[%c0_3, %c0_4] : memref<80x1xf32, #tpu.memory_space<vmem>>, vector<80x1xf32>
    %4 = vector.broadcast %3 : vector<80x1xf32> to vector<80x512xf32>
    %5 = arith.addf %2, %4 : vector<80x512xf32>
    %c0_5 = arith.constant 0 : index
    %c0_6 = arith.constant 0 : index
    %6 = vector.load %arg4[%c0_5, %c0_6] : memref<80x512xf32, #tpu.memory_space<vmem>>, vector<80x512xf32>
    tpu.vector_store %arg4[%c0_5, %c0_6], %5 {strides = array<i32>} : memref<80x512xf32, #tpu.memory_space<vmem>>, vector<80x512xf32>,
    return
  }
  func.func @transform_0(%arg0: i32) -> (i32, i32) {
    %c0_i32 = arith.constant 0 : i32
    %c0_i32_0 = arith.constant 0 : i32
    return %c0_i32, %arg0 : i32, i32
  }
  func.func @transform_1(%arg0: i32) -> (i32, i32) {
    %c0_i32 = arith.constant 0 : i32
    %c0_i32_0 = arith.constant 0 : i32
    %c0_i32_1 = arith.constant 0 : i32
    return %c0_i32, %c0_i32_0 : i32, i32
  }
  func.func @transform_2(%arg0: i32) -> (i32, i32) {
    %c0_i32 = arith.constant 0 : i32
    %c0_i32_0 = arith.constant 0 : i32
    %c0_i32_1 = arith.constant 0 : i32
    return %c0_i32, %c0_i32_0 : i32, i32
  }
  func.func @transform_3(%arg0: i32) -> (i32, i32) {
    %c0_i32 = arith.constant 0 : i32
    %c0_i32_0 = arith.constant 0 : i32
    return %c0_i32, %arg0 : i32, i32
  }
}

</mosaic_0001>

<bundles_post_ra>
// kernel: tpu_custom_call.1
= control target key start
LH: loop header
LB: loop body
LE: loop exit
PB: predicated region body
PF: predicated region fallthrough
CT: control target
= control target key end

     0   :  { %vm89_vm0 = vcmask 64512   ;;  %v477_v5 = vmov 0.0   ;;  %v478_v9 = vmov 0   ;;  %s626_s0 = inlined_call_operand.vmem [shape: f32[8,512], index: 0, kind: input, shape index: {}]   ;;  %s627_s1 = inlined_call_operand.vmem [shape: f32[80,8], index: 1, kind: input, shape index: {}]   ;;  %s628_s2 = inlined_call_operand.vmem [shape: f32[80,1], index: 2, kind: input, shape index: {}]   ;;  %s629_s3 = inlined_call_operand.hbm [shape: f32[80,512], index: 3, kind: output, shape index: {}]  }
   0x1   :  { %v26_v0 = vld [vmem:[%s626_s0 + $0x8] sm:$0xff]  ;;  %v28_v1 = vld [vmem:[%s626_s0 + $0x18] sm:$0xff]  ;;  %v25_v2 = vld [vmem:[%s626_s0] sm:$0xff]  ;;  %184 = vmatprep.mubr.f32.mxu0 %v477_v5  ;;  %309 = vmatprep.mubr.f32.mxu1 %v477_v5 }
   0x2   :  { %120 = vmatprep.subr.mxu0 %v26_v0  ;;  %245 = vmatprep.subr.mxu1 %v28_v1  ;;  %v27_v3 = vld [vmem:[%s626_s0 + $0x10] sm:$0xff]  ;;  %v15_v4 = vld [vmem:[%s627_s1] sm:$0xff]  ;;  %v16_v7 = vld [vmem:[%s627_s1 + $0x8] sm:$0xff] }
   0x3   :  { %121 = vmatpush1.msra.mxu0 %v25_v2  ;;  %246 = vmatpush1.msra.mxu1 %v27_v3  ;;  %v29_v6 = vld [vmem:[%s628_s2] sm:$0xff]  ;;  %v31_v8 = vld [vmem:[%s628_s2 + $0x10] sm:$0xff]  ;;  %v30_v10 = vld [vmem:[%s628_s2 + $0x8] sm:$0xff] }
   0x4   :  { %426 = vmatmul.mubr.msk.f32.vlgmr.msra.gmra.mrb[0].mxu0 %vm89_vm0, %v15_v4  ;;  %436 = vmatmul.mubr.msk.f32.vlgmr.msra.gmra.mrb[0].mxu1 %vm89_vm0, %v15_v4  ;;  %v32_v11 = vld [vmem:[%s628_s2 + $0x18] sm:$0xff] }
   0x5   :  { %190 = vmatprep.mubr.f32.mxu0 %v477_v5  ;;  %315 = vmatprep.mubr.f32.mxu1 %v477_v5 }
   0x6   :  { %451 = vset.pattern.permute.xlu0 %v478_v9  ;;  %452 = vset.pattern.permute.xlu1 %v478_v9 }
   0x7   :  { %41 = vperm.xlu0 %451, %v29_v6   ;;  %51 = vperm.xlu1 %452, %v31_v8  }
   0x8   :  { %427 = vmatmul.mubr.msk.f32.gmra.mrb[2].mxu0 %vm89_vm0, %v16_v7  ;;  %437 = vmatmul.mubr.msk.f32.gmra.mrb[2].mxu1 %vm89_vm0, %v16_v7 }
   0x9   :  { %8 = vsyncpa [#allocation3], 0  ;;  %196 = vmatprep.mubr.f32.mxu0 %v477_v5  ;;  %321 = vmatprep.mubr.f32.mxu1 %v477_v5  ;;  %v17_v12 = vld [vmem:[%s627_s1 + $0x10] sm:$0xff]  ;;  %v34_v13 = vld [vmem:[%s628_s2 + $0x28] sm:$0xff] }
   0xa   :  { %v33_v14 = vld [vmem:[%s628_s2 + $0x20] sm:$0xff]  ;;  %v18_v15 = vld [vmem:[%s627_s1 + $0x18] sm:$0xff]  ;;  %v35_v17 = vld [vmem:[%s628_s2 + $0x30] sm:$0xff] }
   0xb   :  { %46 = vperm.xlu0 %451, %v30_v10   ;;  %56 = vperm.xlu1 %452, %v32_v11   ;;  %v36_v16 = vld [vmem:[%s628_s2 + $0x38] sm:$0xff]  ;;  %v19_v18 = vld [vmem:[%s627_s1 + $0x20] sm:$0xff]  ;;  %v38_v19 = vld [vmem:[%s628_s2 + $0x48] sm:$0xff] }
   0xc   :  { %428 = vmatmul.mubr.msk.f32.gmra.mrb[4].mxu0 %vm89_vm0, %v17_v12  ;;  %438 = vmatmul.mubr.msk.f32.gmra.mrb[4].mxu1 %vm89_vm0, %v17_v12  ;;  %v37_v20 = vld [vmem:[%s628_s2 + $0x40] sm:$0xff]  ;;  %v20_v21 = vld [vmem:[%s627_s1 + $0x28] sm:$0xff]  ;;  %v21_v22 = vld [vmem:[%s627_s1 + $0x30] sm:$0xff] }
   0xd   :  { %202 = vmatprep.mubr.f32.mxu0 %v477_v5  ;;  %327 = vmatprep.mubr.f32.mxu1 %v477_v5  ;;  %v22_v23 = vld [vmem:[%s627_s1 + $0x38] sm:$0xff]  ;;  %v23_v24 = vld [vmem:[%s627_s1 + $0x40] sm:$0xff]  ;;  %v24_v25 = vld [vmem:[%s627_s1 + $0x48] sm:$0xff]  ;;  %s479_s1 = smov [#allocation2]  }
   0xe   :  { %s415_s30 = sshll.u32 %s479_s1, 4  ;;  %s416_s30 = int_to_ptr.vmem [resolvable:$true] %s415_s30 }
   0xf   :  { %66 = vperm.xlu1 %452, %v34_v13   ;;  %61 = vperm.xlu0 %451, %v33_v14   ;;  %s453_s4 = scalar_lea.vmem %s416_s30, 5120  ;;  %p458_p1 = scmp.lt.s32.totalorder %s416_s30, %s416_s30 }
  0x10   :  { %429 = vmatmul.mubr.msk.f32.gmra.mrb[6].mxu0 %vm89_vm0, %v18_v15  ;;  %439 = vmatmul.mubr.msk.f32.gmra.mrb[6].mxu1 %vm89_vm0, %v18_v15  ;;  %p454_p0 = scmp.ne.s32.totalorder %s416_s30, %s453_s4  ;;  %p459_p2 = scmp.lt.s32.totalorder %s453_s4, %s453_s4 }
  0x11   :  { %208 = vmatprep.mubr.f32.mxu0 %v477_v5  ;;  %333 = vmatprep.mubr.f32.mxu1 %v477_v5 }
  0x12   :  { %p460_p3 = por %p459_p2, %p458_p1 }
  0x13   :  { %76 = vperm.xlu1 %452, %v36_v16   ;;  %71 = vperm.xlu0 %451, %v35_v17  }
  0x14   :  { %430 = vmatmul.mubr.msk.f32.gmra.mrb[8].mxu0 %vm89_vm0, %v19_v18  ;;  %440 = vmatmul.mubr.msk.f32.gmra.mrb[8].mxu1 %vm89_vm0, %v19_v18  ;;  %p461_p4 = pnand %p460_p3, %p454_p0 }
  0x15   :  { %214 = vmatprep.mubr.f32.mxu0 %v477_v5  ;;  %339 = vmatprep.mubr.f32.mxu1 %v477_v5 }
  0x17   :  { %86 = vperm.xlu1 %452, %v38_v19   ;;  %81 = vperm.xlu0 %451, %v37_v20  }
  0x18   :  { %431 = vmatmul.mubr.msk.f32.gmra.mrb[10].mxu0 %vm89_vm0, %v20_v21  ;;  %441 = vmatmul.mubr.msk.f32.gmra.mrb[10].mxu1 %vm89_vm0, %v20_v21 }
  0x19   :  { %220 = vmatprep.mubr.f32.mxu0 %v477_v5  ;;  %345 = vmatprep.mubr.f32.mxu1 %v477_v5 }
  0x1c   :  { %432 = vmatmul.mubr.msk.f32.gmra.mrb[12].mxu0 %vm89_vm0, %v21_v22  ;;  %442 = vmatmul.mubr.msk.f32.gmra.mrb[12].mxu1 %vm89_vm0, %v21_v22 }
  0x1d   :  { %226 = vmatprep.mubr.f32.mxu0 %v477_v5  ;;  %351 = vmatprep.mubr.f32.mxu1 %v477_v5 }
  0x20   :  { %433 = vmatmul.mubr.msk.f32.gmra.mrb[14].mxu0 %vm89_vm0, %v22_v23  ;;  %443 = vmatmul.mubr.msk.f32.gmra.mrb[14].mxu1 %vm89_vm0, %v22_v23 }
  0x21   :  { %232 = vmatprep.mubr.f32.mxu0 %v477_v5  ;;  %357 = vmatprep.mubr.f32.mxu1 %v477_v5 }
  0x24   :  { %434 = vmatmul.mubr.msk.f32.gmra.mrb[16].mxu0 %vm89_vm0, %v23_v24  ;;  %444 = vmatmul.mubr.msk.f32.gmra.mrb[16].mxu1 %vm89_vm0, %v23_v24 }
  0x25   :  { %238 = vmatprep.mubr.f32.mxu0 %v477_v5  ;;  %363 = vmatprep.mubr.f32.mxu1 %v477_v5 }
  0x28   :  { %435 = vmatmul.mubr.msk.f32.gmra.mrb[18].mxu0 %vm89_vm0, %v24_v25  ;;  %445 = vmatmul.mubr.msk.f32.gmra.mrb[18].mxu1 %vm89_vm0, %v24_v25 }
  0x86   :  { %v42_v26 = vpop.permute.xlu0 %41  ;;  %v52_v36 = vpop.permute.xlu1 %51 }
  0x8a   :  { %v47_v35 = vpop.permute.xlu0 %46  ;;  %v57_v53 = vpop.permute.xlu1 %56 }
  0x8e   :  { %v62_v62 = vpop.permute.xlu0 %61  ;;  %v67_v7 = vpop.permute.xlu1 %66 }
  0x92   :  { %v72_v16 = vpop.permute.xlu0 %71  ;;  %v77_v25 = vpop.permute.xlu1 %76 }
  0xd7   :  { %v186_v27 = vpop.f32.mrb[0].mxu0  ;;  %v311_v28 = vpop.f32.mrb[0].mxu1 }
  0xd8   :  { %v187_v29 = vadd.f32 %v186_v27, %v42_v26  ;;  %v312_v30 = vadd.f32 %v311_v28, %v42_v26  ;;  %v188_v31 = vpop.f32.mrb[1].mxu0  ;;  %v313_v32 = vpop.f32.mrb[1].mxu1 }
  0xd9   :  { %v189_v33 = vadd.f32 %v188_v31, %v42_v26  ;;  %v314_v34 = vadd.f32 %v313_v32, %v42_v26 }
  0xda   :  { %370 = vst [vmem:[#allocation2] sm:$0xff] %v187_v29  ;;  %372 = vst [vmem:[#allocation2 + $0x10] sm:$0xff] %v312_v30 }
  0xdb   :  { %371 = vst [vmem:[#allocation2 + $0x8] sm:$0xff] %v189_v33  ;;  %373 = vst [vmem:[#allocation2 + $0x18] sm:$0xff] %v314_v34  ;;  %v192_v37 = vpop.f32.mrb[2].mxu0  ;;  %v317_v38 = vpop.f32.mrb[2].mxu1 }
  0xdc   :  { %v193_v39 = vadd.f32 %v192_v37, %v47_v35  ;;  %v318_v40 = vadd.f32 %v317_v38, %v47_v35  ;;  %v194_v41 = vpop.f32.mrb[3].mxu0  ;;  %v319_v42 = vpop.f32.mrb[3].mxu1 }
  0xdd   :  { %v195_v43 = vadd.f32 %v194_v41, %v47_v35  ;;  %v320_v44 = vadd.f32 %v319_v42, %v47_v35  ;;  %v82_v34 = vpop.permute.xlu0 %81 }
  0xde   :  { %374 = vst [vmem:[#allocation2 + $0x20] sm:$0xff] %v193_v39  ;;  %376 = vst [vmem:[#allocation2 + $0x30] sm:$0xff] %v318_v40 }
  0xdf   :  { %375 = vst [vmem:[#allocation2 + $0x28] sm:$0xff] %v195_v43  ;;  %377 = vst [vmem:[#allocation2 + $0x38] sm:$0xff] %v320_v44  ;;  %v198_v45 = vpop.f32.mrb[4].mxu0  ;;  %v323_v46 = vpop.f32.mrb[4].mxu1 }
  0xe0   :  { %v199_v47 = vadd.f32 %v198_v45, %v52_v36  ;;  %v324_v48 = vadd.f32 %v323_v46, %v52_v36  ;;  %v200_v49 = vpop.f32.mrb[5].mxu0  ;;  %v325_v50 = vpop.f32.mrb[5].mxu1 }
  0xe1   :  { %v201_v51 = vadd.f32 %v200_v49, %v52_v36  ;;  %v326_v52 = vadd.f32 %v325_v50, %v52_v36  ;;  %v87_v43 = vpop.permute.xlu1 %86 }
  0xe2   :  { %378 = vst [vmem:[#allocation2 + $0x40] sm:$0xff] %v199_v47  ;;  %380 = vst [vmem:[#allocation2 + $0x50] sm:$0xff] %v324_v48 }
  0xe3   :  { %379 = vst [vmem:[#allocation2 + $0x48] sm:$0xff] %v201_v51  ;;  %381 = vst [vmem:[#allocation2 + $0x58] sm:$0xff] %v326_v52  ;;  %v204_v54 = vpop.f32.mrb[6].mxu0  ;;  %v329_v55 = vpop.f32.mrb[6].mxu1 }
  0xe4   :  { %v205_v56 = vadd.f32 %v204_v54, %v57_v53  ;;  %v330_v57 = vadd.f32 %v329_v55, %v57_v53  ;;  %v206_v58 = vpop.f32.mrb[7].mxu0  ;;  %v331_v59 = vpop.f32.mrb[7].mxu1 }
  0xe5   :  { %v207_v60 = vadd.f32 %v206_v58, %v57_v53  ;;  %v332_v61 = vadd.f32 %v331_v59, %v57_v53 }
  0xe6   :  { %382 = vst [vmem:[#allocation2 + $0x60] sm:$0xff] %v205_v56  ;;  %384 = vst [vmem:[#allocation2 + $0x70] sm:$0xff] %v330_v57 }
  0xe7   :  { %383 = vst [vmem:[#allocation2 + $0x68] sm:$0xff] %v207_v60  ;;  %385 = vst [vmem:[#allocation2 + $0x78] sm:$0xff] %v332_v61  ;;  %v210_v63 = vpop.f32.mrb[8].mxu0  ;;  %v335_v0 = vpop.f32.mrb[8].mxu1 }
  0xe8   :  { %v211_v1 = vadd.f32 %v210_v63, %v62_v62  ;;  %v336_v2 = vadd.f32 %v335_v0, %v62_v62  ;;  %v212_v3 = vpop.f32.mrb[9].mxu0  ;;  %v337_v4 = vpop.f32.mrb[9].mxu1 }
  0xe9   :  { %v213_v5 = vadd.f32 %v212_v3, %v62_v62  ;;  %v338_v6 = vadd.f32 %v337_v4, %v62_v62 }
  0xea   :  { %386 = vst [vmem:[#allocation2 + $0x80] sm:$0xff] %v211_v1  ;;  %388 = vst [vmem:[#allocation2 + $0x90] sm:$0xff] %v336_v2 }
  0xeb   :  { %387 = vst [vmem:[#allocation2 + $0x88] sm:$0xff] %v213_v5  ;;  %389 = vst [vmem:[#allocation2 + $0x98] sm:$0xff] %v338_v6  ;;  %v216_v8 = vpop.f32.mrb[10].mxu0  ;;  %v341_v9 = vpop.f32.mrb[10].mxu1 }
  0xec   :  { %v217_v10 = vadd.f32 %v216_v8, %v67_v7  ;;  %v342_v11 = vadd.f32 %v341_v9, %v67_v7  ;;  %v218_v12 = vpop.f32.mrb[11].mxu0  ;;  %v343_v13 = vpop.f32.mrb[11].mxu1 }
  0xed   :  { %v219_v14 = vadd.f32 %v218_v12, %v67_v7  ;;  %v344_v15 = vadd.f32 %v343_v13, %v67_v7 }
  0xee   :  { %390 = vst [vmem:[#allocation2 + $0xa0] sm:$0xff] %v217_v10  ;;  %392 = vst [vmem:[#allocation2 + $0xb0] sm:$0xff] %v342_v11 }
  0xef   :  { %391 = vst [vmem:[#allocation2 + $0xa8] sm:$0xff] %v219_v14  ;;  %393 = vst [vmem:[#allocation2 + $0xb8] sm:$0xff] %v344_v15  ;;  %v222_v17 = vpop.f32.mrb[12].mxu0  ;;  %v347_v18 = vpop.f32.mrb[12].mxu1 }
  0xf0   :  { %v223_v19 = vadd.f32 %v222_v17, %v72_v16  ;;  %v348_v20 = vadd.f32 %v347_v18, %v72_v16  ;;  %v224_v21 = vpop.f32.mrb[13].mxu0  ;;  %v349_v22 = vpop.f32.mrb[13].mxu1 }
  0xf1   :  { %v225_v23 = vadd.f32 %v224_v21, %v72_v16  ;;  %v350_v24 = vadd.f32 %v349_v22, %v72_v16 }
  0xf2   :  { %394 = vst [vmem:[#allocation2 + $0xc0] sm:$0xff] %v223_v19  ;;  %396 = vst [vmem:[#allocation2 + $0xd0] sm:$0xff] %v348_v20 }
  0xf3   :  { %395 = vst [vmem:[#allocation2 + $0xc8] sm:$0xff] %v225_v23  ;;  %397 = vst [vmem:[#allocation2 + $0xd8] sm:$0xff] %v350_v24  ;;  %v228_v26 = vpop.f32.mrb[14].mxu0  ;;  %v353_v27 = vpop.f32.mrb[14].mxu1 }
  0xf4   :  { %v229_v28 = vadd.f32 %v228_v26, %v77_v25  ;;  %v354_v29 = vadd.f32 %v353_v27, %v77_v25  ;;  %v230_v30 = vpop.f32.mrb[15].mxu0  ;;  %v355_v31 = vpop.f32.mrb[15].mxu1 }
  0xf5   :  { %v231_v32 = vadd.f32 %v230_v30, %v77_v25  ;;  %v356_v33 = vadd.f32 %v355_v31, %v77_v25 }
  0xf6   :  { %398 = vst [vmem:[#allocation2 + $0xe0] sm:$0xff] %v229_v28  ;;  %400 = vst [vmem:[#allocation2 + $0xf0] sm:$0xff] %v354_v29 }
  0xf7   :  { %399 = vst [vmem:[#allocation2 + $0xe8] sm:$0xff] %v231_v32  ;;  %401 = vst [vmem:[#allocation2 + $0xf8] sm:$0xff] %v356_v33  ;;  %v234_v35 = vpop.f32.mrb[16].mxu0  ;;  %v359_v36 = vpop.f32.mrb[16].mxu1 }
  0xf8   :  { %v235_v37 = vadd.f32 %v234_v35, %v82_v34  ;;  %v360_v38 = vadd.f32 %v359_v36, %v82_v34  ;;  %v236_v39 = vpop.f32.mrb[17].mxu0  ;;  %v361_v40 = vpop.f32.mrb[17].mxu1 }
  0xf9   :  { %v237_v41 = vadd.f32 %v236_v39, %v82_v34  ;;  %v362_v42 = vadd.f32 %v361_v40, %v82_v34 }
  0xfa   :  { %402 = vst [vmem:[#allocation2 + $0x100] sm:$0xff] %v235_v37  ;;  %404 = vst [vmem:[#allocation2 + $0x110] sm:$0xff] %v360_v38 }
  0xfb   :  { %403 = vst [vmem:[#allocation2 + $0x108] sm:$0xff] %v237_v41  ;;  %405 = vst [vmem:[#allocation2 + $0x118] sm:$0xff] %v362_v42  ;;  %v240_v44 = vpop.f32.mrb[18].mxu0  ;;  %v365_v45 = vpop.f32.mrb[18].mxu1 }
  0xfc   :  { %v241_v46 = vadd.f32 %v240_v44, %v87_v43  ;;  %v366_v47 = vadd.f32 %v365_v45, %v87_v43  ;;  %v242_v48 = vpop.f32.mrb[19].mxu0  ;;  %v367_v49 = vpop.f32.mrb[19].mxu1 }
  0xfd   :  { %v243_v50 = vadd.f32 %v242_v48, %v87_v43  ;;  %v368_v51 = vadd.f32 %v367_v49, %v87_v43 }
  0xfe   :  { %406 = vst [vmem:[#allocation2 + $0x120] sm:$0xff] %v241_v46  ;;  %408 = vst [vmem:[#allocation2 + $0x130] sm:$0xff] %v366_v47 }
  0xff   :  { %407 = vst [vmem:[#allocation2 + $0x128] sm:$0xff] %v243_v50  ;;  %409 = vst [vmem:[#allocation2 + $0x138] sm:$0xff] %v368_v51 }
 0x100   :  { %464 = shalt.err (!%p461_p4)
}
 0x101   :  { %s465_s7 = scalar_lea.hbm %s629_s3, 5120 }
 0x102   :  { %p466_p5 = scmp.ne.s32.totalorder %s629_s3, %s465_s7  ;;  %p469_p6 = scmp.lt.u32.totalorder %s465_s7, %s629_s3 }
 0x104   :  { %p471_p7 = pnand %p469_p6, %p466_p5 }
 0x106   :  { %474 = shalt.err (!%p471_p7)
}
 0x107   :  { %s480_s12 = smov 512   ;;  %s481_s13 = smov 32  }
 0x108   :  { %421 = dma.vmem_to_hbm [thread:$0]  %s416_s30, 5120, %s629_s3, [#allocation3], %s480_s12, %s480_s12, %s481_s13  }
 0x109   :  { %475 = dma.done.wait [#allocation3], 5120  }
 0x10a   :  { %476 = vsyncadd [#allocation3], 4294962176 }
 0x10b   :  { %425 = vsyncpa [#allocation3], 1 }

</bundles_post_ra>
